<compile_context>
chip_gen: v5e
topology: v5e:2x2
jax: 0.10.0
libtpu: 0.0.40
codegen_flags: <defaults>
</compile_context>

<pallas_src>
import jax
import jax.numpy as jnp
from jax.experimental import pallas as pl
from jax.experimental.pallas import tpu as pltpu


# ---------------------------------------------------------------------------
# Kernels
# ---------------------------------------------------------------------------
def _reg_head_kernel_full(x_ref, w_ref, b_ref, o_ref):
    # Full-S tile: single pass, no accumulator.
    # x_ref: (TB, C, S)   w_ref: (1, C) pre-scaled by 1/S   b_ref: (1,1) SMEM
    x = x_ref[...].astype(jnp.float32)
    pooled = jnp.sum(x, axis=-1)                                  # (TB, C)
    w = w_ref[...].astype(jnp.float32)                            # (1, C)
    o_ref[...] = (jnp.sum(pooled * w, axis=-1, keepdims=True)
                  + b_ref[0, 0]).astype(o_ref.dtype)


def _reg_head_kernel_split(x_ref, w_ref, b_ref, o_ref, acc_ref):
    # Split-S tile: accumulate partial spatial sums in (TB, C) f32 scratch,
    # contract with the weight only in the finalize branch.
    k = pl.program_id(1)

    @pl.when(k == 0)
    def _():
        acc_ref[...] = jnp.zeros_like(acc_ref)

    acc_ref[...] += jnp.sum(x_ref[...].astype(jnp.float32), axis=-1)   # (TB, C)

    @pl.when(k == pl.num_programs(1) - 1)
    def _():
        w = w_ref[...].astype(jnp.float32)                        # (1, C)
        o_ref[...] = (jnp.sum(acc_ref[...] * w, axis=-1, keepdims=True)
                      + b_ref[0, 0]).astype(o_ref.dtype)


# ---------------------------------------------------------------------------
# Tiling / budgets
# ---------------------------------------------------------------------------
def _vmem_budget():
    """Generation-aware (x double-buffer budget, vmem_limit_bytes)."""
    cap = 64 << 20  # conservative fallback (v7x per-TC VMEM)
    try:
        info = pltpu.get_tpu_info()
        cap = int(getattr(info, "vmem_capacity_bytes", cap)) or cap
    except Exception:
        pass
    # 128 MiB parts (v5e/v6e): ~56 MiB of double-buffered x, 112 MiB scoped limit.
    # 64 MiB parts (v7x):      ~24 MiB of double-buffered x,  56 MiB scoped limit.
    x_budget = max(cap // 2 - (8 << 20), 4 << 20)
    vmem_limit = max(min(cap - (8 << 20), 112 << 20), 32 << 20)
    return x_budget, vmem_limit


def _choose_tiles(B, C, S, itemsize, x_budget):
    """Return (TB, TS): prefer TS = S and split B; split S only if forced."""

    def x_bytes(tb, ts):
        return 2 * tb * C * ts * itemsize  # double-buffered x tile

    # Legal batch tiles for the (TB, 1) output block: multiples of 8, or B itself.
    tb_cands = sorted({d for d in range(8, B + 1, 8) if B % d == 0} | {B},
                      reverse=True)

    # --- Preferred: full spatial extent (contiguous DMA, no reduction axis) ---
    fitting = [tb for tb in tb_cands if x_bytes(tb, S) <= x_budget]
    if fitting:
        tb = max(fitting)
        if tb == B and B >= 16:
            # Guarantee >= 2 blocks along the parallel B axis (v7x megacore).
            halves = [t for t in fitting if t <= B // 2]
            if halves:
                tb = max(halves)
        return tb, S

    # --- Forced S split: smallest legal TB, largest 128-aligned TS that fits ---
    tb = min(tb_cands)
    ts_cands = [ts for ts in range(128, S, 128)
                if S % ts == 0 and x_bytes(tb, ts) <= x_budget]
    if ts_cands:
        return tb, max(ts_cands)
    # Last resort (unaligned / huge S): take full S and rely on the raised
    # vmem_limit_bytes rather than silently producing an illegal block shape.
    return tb, S


# ---------------------------------------------------------------------------
# Wrapper
# ---------------------------------------------------------------------------
def reg_head_forward(x_nchw, weight, bias, *, x_vmem_budget=None):
    """x_nchw: (B, C, H, W), weight: (1, C), bias: (1,) -> (B, 1) float32."""
    B, C, H, W = x_nchw.shape
    S = H * W
    x_bcs = x_nchw.reshape(B, C, S)                 # flatten(start_dim=2), free

    # Fold the 1/S of AdaptiveAvgPool1d(1) into the weight; keep it lane-dense.
    w_scaled = (weight.astype(jnp.float32) / jnp.float32(S)).reshape(1, C)
    bias2d = bias.astype(jnp.float32).reshape(1, 1)

    budget, vmem_limit = _vmem_budget()
    if x_vmem_budget is not None:                   # test hook / manual override
        budget = x_vmem_budget
    TB, TS = _choose_tiles(B, C, S, x_bcs.dtype.itemsize, budget)

    cparams = pltpu.CompilerParams(vmem_limit_bytes=vmem_limit,
                                   dimension_semantics=("parallel",)
                                   if TS == S else ("parallel", "arbitrary"))

    if TS == S:
        # Single reduction-free pass per batch tile.
        grid_spec = pltpu.PrefetchScalarGridSpec(
            num_scalar_prefetch=0,
            grid=(B // TB,),
            in_specs=[
                pl.BlockSpec((TB, C, S), lambda i: (i, 0, 0)),
                pl.BlockSpec((1, C), lambda i: (0, 0)),
                pl.BlockSpec((1, 1), lambda i: (0, 0),
                             memory_space=pltpu.MemorySpace.SMEM),
            ],
            out_specs=pl.BlockSpec((TB, 1), lambda i: (i, 0)),
        )
        kernel = _reg_head_kernel_full
    else:
        # B parallel, S (reduction) last; (TB, C) f32 partial-sum accumulator.
        grid_spec = pltpu.PrefetchScalarGridSpec(
            num_scalar_prefetch=0,
            grid=(B // TB, S // TS),
            in_specs=[
                pl.BlockSpec((TB, C, TS), lambda i, k: (i, 0, k)),
                pl.BlockSpec((1, C), lambda i, k: (0, 0)),
                pl.BlockSpec((1, 1), lambda i, k: (0, 0),
                             memory_space=pltpu.MemorySpace.SMEM),
            ],
            out_specs=pl.BlockSpec((TB, 1), lambda i, k: (i, 0)),
            scratch_shapes=[pltpu.VMEM((TB, C), jnp.float32)],
        )
        kernel = _reg_head_kernel_split

    return pl.pallas_call(
        kernel,
        out_shape=jax.ShapeDtypeStruct((B, 1), jnp.float32),
        grid_spec=grid_spec,
        compiler_params=cparams,
    )(x_bcs, w_scaled, bias2d)


# ---------------------------------------------------------------------------
# Reference + tests
# ---------------------------------------------------------------------------
def _reference(x_nchw, weight, bias):
    B, C, H, W = x_nchw.shape
    pooled = jnp.mean(x_nchw.reshape(B, C, H * W).astype(jnp.float32), axis=-1)
    return pooled @ weight.astype(jnp.float32).T + bias.astype(jnp.float32)


if __name__ == "__main__":
    # Module config: version=1, num_tokens=96 (== channel count C)
    num_tokens = 96
    B, C, H, W = 2, num_tokens, 8, 8

    key = jax.random.PRNGKey(0)
    kx, kw, kb, kx2 = jax.random.split(key, 4)

    x = jax.random.normal(kx, (B, C, H, W), dtype=jnp.float32)

    # Deterministic nn.Linear-style init: U(-1/sqrt(in), 1/sqrt(in))
    bound = 1.0 / (num_tokens ** 0.5)
    weight = jax.random.uniform(kw, (1, num_tokens), jnp.float32, -bound, bound)
    bias = jax.random.uniform(kb, (1,), jnp.float32, -bound, bound)

    # 1) Small, module-consistent shape (single block, full-S kernel).
    out = jax.block_until_ready(reg_head_forward(x, weight, bias))
    ref = _reference(x, weight, bias)
    assert out.shape == (B, 1)
    assert jnp.allclose(out, ref, atol=1e-5, rtol=1e-5), (out, ref)

    # 2) Larger shape: full-S kernel with the B axis split across >= 2 blocks.
    B2, H2, W2 = 16, 32, 32
    x2 = jax.random.normal(kx2, (B2, C, H2, W2), dtype=jnp.float32)
    out2 = jax.block_until_ready(reg_head_forward(x2, weight, bias))
    ref2 = _reference(x2, weight, bias)
    assert out2.shape == (B2, 1)
    assert jnp.allclose(out2, ref2, atol=1e-4, rtol=1e-5), (out2, ref2)

    # 3) Force the split-S accumulator path via a tiny artificial budget
    #    (TB=8, TS=512 -> grid (2, 2)) and check it matches too.
    out3 = jax.block_until_ready(
        reg_head_forward(x2, weight, bias, x_vmem_budget=4 << 20))
    assert jnp.allclose(out3, ref2, atol=1e-4, rtol=1e-5), (out3, ref2)

    # 4) bf16 input contract: no wrapper pre-cast, f32 accumulation in-kernel.
    x2_bf16 = x2.astype(jnp.bfloat16)
    out4 = jax.block_until_ready(reg_head_forward(x2_bf16, weight, bias))
    ref4 = _reference(x2_bf16, weight, bias)
    assert jnp.allclose(out4, ref4, atol=1e-3, rtol=1e-3), (out4, ref4)

    print("KERNEL_OK")
</pallas_src>

<mosaic_0001>
module attributes {stable_mosaic.version = 11 : i64} {
  func.func @_reg_head_kernel_full(%arg0: i32, %arg1: memref<2x96x64xf32, #tpu.memory_space<vmem>>, %arg2: memref<1x96xf32, #tpu.memory_space<vmem>>, %arg3: memref<1x1xf32, #tpu.memory_space<smem>>, %arg4: memref<2x1xf32, #tpu.memory_space<vmem>>) attributes {dimension_semantics = [#tpu.dimension_semantics<parallel>], iteration_bounds = array<i64: 1>, scalar_prefetch = 0 : i64, scratch_operands = 0 : i64, tpu.core_type = #tpu.core_type<tc>, window_params = [{transform_indices = @transform_0, window_bounds = array<i64: 2, 96, 64>}, {pipeline_mode = #tpu.pipeline_mode<synchronous>, transform_indices = @transform_1, window_bounds = array<i64: 1, 96>}, {transform_indices = @transform_2, window_bounds = array<i64: 1, 1>}, {transform_indices = @transform_3, window_bounds = array<i64: 2, 1>}]} {
    %c0 = arith.constant 0 : index
    %c0_0 = arith.constant 0 : index
    %c0_1 = arith.constant 0 : index
    %0 = vector.load %arg1[%c0, %c0_0, %c0_1] : memref<2x96x64xf32, #tpu.memory_space<vmem>>, vector<2x96x64xf32>
    %cst = arith.constant dense<0.000000e+00> : vector<2x96xf32>
    %1 = vector.multi_reduction <add>, %0, %cst [2] : vector<2x96x64xf32> to vector<2x96xf32>
    %c0_2 = arith.constant 0 : index
    %c0_3 = arith.constant 0 : index
    %2 = vector.load %arg2[%c0_2, %c0_3] : memref<1x96xf32, #tpu.memory_space<vmem>>, vector<1x96xf32>
    %3 = vector.broadcast %2 : vector<1x96xf32> to vector<2x96xf32>
    %4 = arith.mulf %1, %3 : vector<2x96xf32>
    %cst_4 = arith.constant dense<0.000000e+00> : vector<2xf32>
    %5 = vector.multi_reduction <add>, %4, %cst_4 [1] : vector<2x96xf32> to vector<2xf32>
    %6 = vector.shape_cast %5 : vector<2xf32> to vector<2x1xf32>
    %c0_5 = arith.constant 0 : index
    %c0_6 = arith.constant 0 : index
    %7 = memref.load %arg3[%c0_5, %c0_6] : memref<1x1xf32, #tpu.memory_space<smem>>
    %8 = vector.broadcast %7 : f32 to vector<2x1xf32>
    %9 = arith.addf %6, %8 : vector<2x1xf32>
    %c0_7 = arith.constant 0 : index
    %c0_8 = arith.constant 0 : index
    %10 = vector.load %arg4[%c0_7, %c0_8] : memref<2x1xf32, #tpu.memory_space<vmem>>, vector<2x1xf32>
    tpu.vector_store %arg4[%c0_7, %c0_8], %9 {strides = array<i32>} : memref<2x1xf32, #tpu.memory_space<vmem>>, vector<2x1xf32>,
    return
  }
  func.func @transform_0(%arg0: i32) -> (i32, i32, i32) {
    %c0_i32 = arith.constant 0 : i32
    %c0_i32_0 = arith.constant 0 : i32
    %c0_i32_1 = arith.constant 0 : i32
    return %arg0, %c0_i32, %c0_i32_0 : i32, i32, i32
  }
  func.func @transform_1(%arg0: i32) -> (i32, i32) {
    %c0_i32 = arith.constant 0 : i32
    %c0_i32_0 = arith.constant 0 : i32
    %c0_i32_1 = arith.constant 0 : i32
    return %c0_i32, %c0_i32_0 : i32, i32
  }
  func.func @transform_2(%arg0: i32) -> (i32, i32) {
    %c0_i32 = arith.constant 0 : i32
    %c0_i32_0 = arith.constant 0 : i32
    %c0_i32_1 = arith.constant 0 : i32
    return %c0_i32, %c0_i32_0 : i32, i32
  }
  func.func @transform_3(%arg0: i32) -> (i32, i32) {
    %c0_i32 = arith.constant 0 : i32
    %c0_i32_0 = arith.constant 0 : i32
    return %arg0, %c0_i32 : i32, i32
  }
}

</mosaic_0001>

<bundles_post_ra>
// kernel: tpu_custom_call.1
= control target key start
LH: loop header
LB: loop body
LE: loop exit
PB: predicated region body
PF: predicated region fallthrough
CT: control target
= control target key end

     0   :  { %vm39_vm0 = vcmask 523264   ;;  %v115_v24 = vlaneseq  ;;  %vm324_vm1 = vcmask 130112   ;;  %vm328_vm2 = vcmask 195712   ;;  %s597_s0 = inlined_call_operand.vmem [shape: f32[2,96,64], index: 0, kind: input, shape index: {}]   ;;  %s598_s1 = inlined_call_operand.vmem [shape: f32[1,96], index: 1, kind: input, shape index: {}]   ;;  %s599_s2 = inlined_call_operand.<no memory space> [shape: f32[1,1], index: 2, kind: input, shape index: {}]   ;;  %s600_s3 = inlined_call_operand.vmem [shape: f32[2,1], index: 3, kind: output, shape index: {}]  }
   0x1   :  { %v19_v0 = vld [vmem:[%s597_s0 + $0x20] sm:$0xff]  ;;  %v17_v1 = vld [vmem:[%s597_s0 + $0x10] sm:$0xff]  ;;  %v20_v6 = vld [vmem:[%s597_s0 + $0x28] sm:$0xff]  ;;  %vm332_vm3 = vcmask 261312   ;;  %vm336_vm4 = vcmask 326912   ;;  %vm340_vm5 = vcmask 392512  }
   0x2   :  { %v15_v2 = vld [vmem:[%s597_s0] sm:$0xff]  ;;  %v52_v3 = vsel %vm39_vm0, %v19_v0, 0.0  ;;  %v46_v4 = vsel %vm39_vm0, %v17_v1, 0.0  ;;  %v18_v7 = vld [vmem:[%s597_s0 + $0x18] sm:$0xff]  ;;  %v16_v8 = vld [vmem:[%s597_s0 + $0x8] sm:$0xff]  ;;  %v55_v9 = vsel %vm39_vm0, %v20_v6, 0.0 }
   0x3   :  { %v40_v5 = vsel %vm39_vm0, %v15_v2, 0.0  ;;  %53 = vadd.xlane.f32.xlu2 %v52_v3  ;;  %47 = vadd.xlane.f32.xlu1 %v46_v4  ;;  %v49_v10 = vsel %vm39_vm0, %v18_v7, 0.0  ;;  %v43_v11 = vsel %vm39_vm0, %v16_v8, 0.0  ;;  %v23_v12 = vld [vmem:[%s597_s0 + $0x40] sm:$0xff]  ;;  %v22_v13 = vld [vmem:[%s597_s0 + $0x38] sm:$0xff]  ;;  %v21_v14 = vld [vmem:[%s597_s0 + $0x30] sm:$0xff] }
   0x4   :  { %41 = vadd.xlane.f32.xlu0 %v40_v5  ;;  %v64_v15 = vsel %vm39_vm0, %v23_v12, 0.0  ;;  %v61_v16 = vsel %vm39_vm0, %v22_v13, 0.0  ;;  %v58_v17 = vsel %vm39_vm0, %v21_v14, 0.0  ;;  %v26_v18 = vld [vmem:[%s597_s0 + $0x58] sm:$0xff]  ;;  %v25_v19 = vld [vmem:[%s597_s0 + $0x50] sm:$0xff]  ;;  %v24_v20 = vld [vmem:[%s597_s0 + $0x48] sm:$0xff] }
   0x5   :  { %v73_v21 = vsel %vm39_vm0, %v26_v18, 0.0  ;;  %v70_v22 = vsel %vm39_vm0, %v25_v19, 0.0  ;;  %v67_v23 = vsel %vm39_vm0, %v24_v20, 0.0  ;;  %v29_v25 = vld [vmem:[%s597_s0 + $0x70] sm:$0xff]  ;;  %v28_v26 = vld [vmem:[%s597_s0 + $0x68] sm:$0xff]  ;;  %v27_v27 = vld [vmem:[%s597_s0 + $0x60] sm:$0xff] }
   0x6   :  { %v501_v28 = vshrl.u32 %v115_v24, 7  ;;  %v82_v29 = vsel %vm39_vm0, %v29_v25, 0.0  ;;  %v79_v30 = vsel %vm39_vm0, %v28_v26, 0.0  ;;  %v76_v33 = vsel %vm39_vm0, %v27_v27, 0.0  ;;  %v32_v34 = vld [vmem:[%s597_s0 + $0x88] sm:$0xff]  ;;  %v31_v35 = vld [vmem:[%s597_s0 + $0x80] sm:$0xff] }
   0x7   :  { %v30_v36 = vld [vmem:[%s597_s0 + $0x78] sm:$0xff]  ;;  %v91_v37 = vsel %vm39_vm0, %v32_v34, 0.0  ;;  %v88_v38 = vsel %vm39_vm0, %v31_v35, 0.0  ;;  %v35_v40 = vld [vmem:[%s597_s0 + $0xa0] sm:$0xff]  ;;  %v33_v42 = vld [vmem:[%s597_s0 + $0x90] sm:$0xff]  ;;  %vm344_vm6 = vcmask 458112  }
   0x8   :  { %406 = vset.pattern.permute.xlu0 %v501_v28  ;;  %v129_v31 = vadd.s32 16, %v501_v28  ;;  %v123_v32 = vadd.s32 8, %v501_v28  ;;  %v85_v39 = vsel %vm39_vm0, %v30_v36, 0.0  ;;  %v34_v41 = vld [vmem:[%s597_s0 + $0x98] sm:$0xff]  ;;  %v100_v43 = vsel %vm39_vm0, %v35_v40, 0.0  ;;  %v37_v47 = vld [vmem:[%s597_s0 + $0xb0] sm:$0xff] }
   0x9   :  { %v97_v44 = vsel %vm39_vm0, %v34_v41, 0.0  ;;  %v94_v45 = vsel %vm39_vm0, %v33_v42, 0.0  ;;  %v38_v46 = vld [vmem:[%s597_s0 + $0xb8] sm:$0xff]  ;;  %v36_v48 = vld [vmem:[%s597_s0 + $0xa8] sm:$0xff]  ;;  %v106_v50 = vsel %vm39_vm0, %v37_v47, 0.0  ;;  %v159_v53 = vadd.s32 56, %v501_v28 }
   0xa   :  { %408 = vset.pattern.permute.xlu2 %v129_v31  ;;  %407 = vset.pattern.permute.xlu1 %v123_v32  ;;  %v109_v49 = vsel %vm39_vm0, %v38_v46, 0.0  ;;  %v103_v51 = vsel %vm39_vm0, %v36_v48, 0.0  ;;  %v421_v52 = vld [vmem:[%s598_s1] ss:$0 sm:$0xff]  ;;  %v135_v54 = vadd.s32 24, %v501_v28  ;;  %v141_v55 = vadd.s32 32, %v501_v28 }
   0xb   :  { %56 = vadd.xlane.f32.xlu2 %v55_v9  ;;  %50 = vadd.xlane.f32.xlu1 %v49_v10  ;;  %v147_v56 = vadd.s32 40, %v501_v28  ;;  %v153_v57 = vadd.s32 48, %v501_v28  ;;  %v165_v59 = vadd.s32 64, %v501_v28  ;;  %v171_v61 = vadd.s32 72, %v501_v28 }
   0xc   :  { %44 = vadd.xlane.f32.xlu0 %v43_v11  ;;  %v177_v3 = vadd.s32 80, %v501_v28  ;;  %v183_v5 = vadd.s32 88, %v501_v28  ;;  %v422_v11 = vmov 0   ;;  %vm348_vm7 = vcmask 523712  }
   0xd   :  { %vm352_vm8 = vcmask 589312   ;;  %vm356_vm9 = vcmask 654912   ;;  %vm360_vm10 = vcmask 720512   ;;  %vm364_vm11 = vcmask 786112  }
   0xe   :  { %vm389_vm12 = vcmask 1041409   ;;  %vm392_vm13 = vcmask 779264   ;;  %vm399_vm14 = vcmask 1024  }
  0x13   :  { %65 = vadd.xlane.f32.xlu2 %v64_v15  ;;  %62 = vadd.xlane.f32.xlu1 %v61_v16 }
  0x14   :  { %59 = vadd.xlane.f32.xlu0 %v58_v17 }
  0x1b   :  { %74 = vadd.xlane.f32.xlu2 %v73_v21  ;;  %71 = vadd.xlane.f32.xlu1 %v70_v22 }
  0x1c   :  { %68 = vadd.xlane.f32.xlu0 %v67_v23 }
  0x23   :  { %83 = vadd.xlane.f32.xlu2 %v82_v29  ;;  %80 = vadd.xlane.f32.xlu1 %v79_v30 }
  0x24   :  { %77 = vadd.xlane.f32.xlu0 %v76_v33 }
  0x2b   :  { %92 = vadd.xlane.f32.xlu2 %v91_v37  ;;  %89 = vadd.xlane.f32.xlu1 %v88_v38 }
  0x2c   :  { %86 = vadd.xlane.f32.xlu0 %v85_v39 }
  0x33   :  { %101 = vadd.xlane.f32.xlu2 %v100_v43  ;;  %98 = vadd.xlane.f32.xlu1 %v97_v44 }
  0x34   :  { %95 = vadd.xlane.f32.xlu0 %v94_v45 }
  0x3b   :  { %110 = vadd.xlane.f32.xlu2 %v109_v49  ;;  %107 = vadd.xlane.f32.xlu1 %v106_v50 }
  0x3c   :  { %104 = vadd.xlane.f32.xlu0 %v103_v51 }
  0x50   :  { %119 = vperm.xlu0 %406, %v421_v52  }
  0x53   :  { %131 = vperm.xlu2 %408, %v421_v52  }
  0x54   :  { %125 = vperm.xlu1 %407, %v421_v52  }
  0x58   :  { %413 = vset.pattern.permute.xlu0 %v159_v53 }
  0x5b   :  { %409 = vset.pattern.permute.xlu2 %v135_v54 }
  0x5c   :  { %410 = vset.pattern.permute.xlu1 %v141_v55 }
  0x60   :  { %161 = vperm.xlu0 %413, %v421_v52  }
  0x63   :  { %137 = vperm.xlu2 %409, %v421_v52  }
  0x64   :  { %143 = vperm.xlu1 %410, %v421_v52  }
  0x68   :  { %418 = vset.pattern.permute.xlu0 %v422_v11 }
  0x6b   :  { %411 = vset.pattern.permute.xlu2 %v147_v56 }
  0x6c   :  { %412 = vset.pattern.permute.xlu1 %v153_v57 }
  0x73   :  { %149 = vperm.xlu2 %411, %v421_v52  }
  0x74   :  { %155 = vperm.xlu1 %412, %v421_v52  }
  0x76   :  { %v54_v58 = vpop.xlane.xlu2 %53  ;;  %v48_v62 = vpop.xlane.xlu1 %47 }
  0x77   :  { %v42_v60 = vpop.xlane.xlu0 %41 }
  0x7b   :  { %414 = vset.pattern.permute.xlu2 %v165_v59 }
  0x7c   :  { %415 = vset.pattern.permute.xlu1 %v171_v61 }
  0x7e   :  { %v57_v63 = vpop.xlane.xlu2 %56  ;;  %v51_v1 = vpop.xlane.xlu1 %50 }
  0x7f   :  { %v45_v0 = vpop.xlane.xlu0 %44 }
  0x83   :  { %167 = vperm.xlu2 %414, %v421_v52  }
  0x84   :  { %173 = vperm.xlu1 %415, %v421_v52  }
  0x86   :  { %v66_v2 = vpop.xlane.xlu2 %65  ;;  %v63_v6 = vpop.xlane.xlu1 %62 }
  0x87   :  { %v60_v4 = vpop.xlane.xlu0 %59 }
  0x8b   :  { %416 = vset.pattern.permute.xlu2 %v177_v3 }
  0x8c   :  { %417 = vset.pattern.permute.xlu1 %v183_v5 }
  0x8e   :  { %v557_v7 = vpop.xlane.xlu2 %74  ;;  %v72_v9 = vpop.xlane.xlu1 %71 }
  0x8f   :  { %v69_v8 = vpop.xlane.xlu0 %68 }
  0x93   :  { %179 = vperm.xlu2 %416, %v421_v52  }
  0x94   :  { %185 = vperm.xlu1 %417, %v421_v52  }
  0x96   :  { %v84_v10 = vpop.xlane.xlu2 %83  ;;  %v81_v14 = vpop.xlane.xlu1 %80 }
  0x97   :  { %v78_v12 = vpop.xlane.xlu0 %77 }
  0x9b   :  { %419 = vset.pattern.permute.xlu2 %v422_v11 }
  0x9c   :  { %420 = vset.pattern.permute.xlu1 %v422_v11 }
  0x9e   :  { %v93_v13 = vpop.xlane.xlu2 %92  ;;  %v90_v17 = vpop.xlane.xlu1 %89 }
  0x9f   :  { %v87_v15 = vpop.xlane.xlu0 %86 }
  0xa6   :  { %v102_v16 = vpop.xlane.xlu2 %101  ;;  %v99_v20 = vpop.xlane.xlu1 %98 }
  0xa7   :  { %v96_v19 = vpop.xlane.xlu0 %95 }
  0xae   :  { %v111_v18 = vpop.xlane.xlu2 %110  ;;  %v108_v25 = vpop.xlane.xlu1 %107 }
  0xaf   :  { %v105_v23 = vpop.xlane.xlu0 %104 }
  0xb6   :  { %v132_v21 = vpop.permute.xlu2 %131 }
  0xb7   :  { %v201_v22 = vmul.f32 %v132_v21, %v48_v62  ;;  %v213_v46 = vmul.f32 %v132_v21, %v84_v10  ;;  %v571_v10 = vand.u32 127, %v115_v24 }
  0xb9   :  { %254 = vperm.xlu1 %420, %v201_v22   ;;  %v322_v11 = vadd.s32 4294967288, %v571_v10  ;;  %v330_v21 = vadd.s32 4294967272, %v571_v10  ;;  %v334_v24 = vadd.s32 4294967264, %v571_v10 }
  0xbe   :  { %v138_v28 = vpop.permute.xlu2 %137 }
  0xbf   :  { %v202_v33 = vmul.f32 %v138_v28, %v51_v1  ;;  %v214_v44 = vmul.f32 %v138_v28, %v87_v15  ;;  %v338_v28 = vadd.s32 4294967256, %v571_v10 }
  0xc2   :  { %v120_v26 = vpop.permute.xlu0 %119 }
  0xc3   :  { %v199_v27 = vmul.f32 %v120_v26, %v42_v60  ;;  %v211_v40 = vmul.f32 %v120_v26, %v78_v12  ;;  %v326_v12 = vadd.s32 4294967280, %v571_v10 }
  0xc5   :  { %248 = vperm.xlu0 %418, %v199_v27  }
  0xc6   :  { %v126_v29 = vpop.permute.xlu1 %125 }
  0xc7   :  { %v200_v30 = vmul.f32 %v126_v29, %v45_v0  ;;  %v212_v52 = vmul.f32 %v126_v29, %v81_v14 }
  0xc9   :  { %251 = vperm.xlu2 %419, %v200_v30  }
  0xcd   :  { %v150_v31 = vpop.permute.xlu2 %149 }
  0xce   :  { %v204_v32 = vmul.f32 %v150_v31, %v57_v63  ;;  %v216_v50 = vmul.f32 %v150_v31, %v93_v13 }
  0xd0   :  { %263 = vperm.xlu0 %418, %v204_v32  }
  0xd1   :  { %257 = vperm.xlu2 %419, %v202_v33  }
  0xd2   :  { %v162_v36 = vpop.permute.xlu0 %161 }
  0xd3   :  { %v206_v39 = vmul.f32 %v162_v36, %v63_v6 }
  0xd6   :  { %v144_v34 = vpop.permute.xlu1 %143 }
  0xd7   :  { %v203_v35 = vmul.f32 %v144_v34, %v54_v58  ;;  %v215_v55 = vmul.f32 %v144_v34, %v90_v17  ;;  %v218_v58 = vmul.f32 %v162_v36, %v99_v20 }
  0xd9   :  { %260 = vperm.xlu1 %420, %v203_v35  }
  0xdd   :  { %v168_v37 = vpop.permute.xlu2 %167 }
  0xde   :  { %v207_v38 = vmul.f32 %v168_v37, %v66_v2  ;;  %v219_v53 = vmul.f32 %v168_v37, %v102_v16  ;;  %v342_v37 = vadd.s32 4294967248, %v571_v10 }
  0xe0   :  { %272 = vperm.xlu0 %418, %v207_v38  }
  0xe1   :  { %269 = vperm.xlu1 %420, %v206_v39   ;;  %v346_v39 = vadd.s32 4294967240, %v571_v10 }
  0xe6   :  { %v156_v41 = vpop.permute.xlu1 %155 }
  0xe7   :  { %v205_v42 = vmul.f32 %v156_v41, %v60_v4  ;;  %v217_v47 = vmul.f32 %v156_v41, %v96_v19 }
  0xe8   :  { %284 = vperm.xlu0 %418, %v211_v40  }
  0xe9   :  { %266 = vperm.xlu2 %419, %v205_v42  }
  0xed   :  { %v180_v43 = vpop.permute.xlu2 %179 }
  0xee   :  { %v209_v45 = vmul.f32 %v180_v43, %v72_v9  ;;  %v221_v59 = vmul.f32 %v180_v43, %v108_v25 }
  0xf0   :  { %293 = vperm.xlu0 %418, %v214_v44   ;;  %278 = vperm.xlu1 %420, %v209_v45  }
  0xf6   :  { %v174_v48 = vpop.permute.xlu1 %173 }
  0xf7   :  { %v208_v49 = vmul.f32 %v174_v48, %v69_v8  ;;  %v220_v51 = vmul.f32 %v174_v48, %v105_v23 }
  0xf8   :  { %302 = vperm.xlu0 %418, %v217_v47   ;;  %290 = vperm.xlu1 %420, %v213_v46   ;;  %v350_v47 = vadd.s32 4294967232, %v571_v10 }
  0xf9   :  { %275 = vperm.xlu2 %419, %v208_v49  }
 0x100   :  { %311 = vperm.xlu0 %418, %v220_v51   ;;  %299 = vperm.xlu1 %420, %v216_v50  }
 0x101   :  { %287 = vperm.xlu2 %419, %v212_v52  }
 0x106   :  { %v186_v54 = vpop.permute.xlu1 %185 }
 0x107   :  { %v222_v56 = vmul.f32 %v186_v54, %v111_v18  ;;  %v210_v57 = vmul.f32 %v186_v54, %v557_v7 }
 0x108   :  { %308 = vperm.xlu1 %420, %v219_v53   ;;  %v354_v53 = vadd.s32 4294967224, %v571_v10 }
 0x109   :  { %296 = vperm.xlu2 %419, %v215_v55   ;;  %317 = vperm.xlu0 %418, %v222_v56   ;;  %v358_v56 = vadd.s32 4294967216, %v571_v10 }
 0x110   :  { %281 = vperm.xlu1 %420, %v210_v57  }
 0x111   :  { %305 = vperm.xlu2 %419, %v218_v58  }
 0x119   :  { %314 = vperm.xlu2 %419, %v221_v59  }
 0x123   :  { %v252_v60 = vpop.permute.xlu2 %251 }
 0x124   :  { %v323_v20 = vperm.slane %v252_v60, %v322_v11 }
 0x12b   :  { %v258_v62 = vpop.permute.xlu2 %257  ;;  %v255_v63 = vpop.permute.xlu1 %254 }
 0x12c   :  { %v327_v26 = vperm.slane %v255_v63, %v326_v12  ;;  %v331_v33 = vperm.slane %v258_v62, %v330_v21 }
 0x137   :  { %v249_v61 = vpop.permute.xlu0 %248 }
 0x138   :  { %v321_v17 = vperm.slane %v249_v61, %v571_v10 }
 0x13a   :  { %v325_v23 = vsel %vm324_vm1, %v323_v20, %v321_v17 }
 0x13b   :  { %v329_v29 = vsel %vm328_vm2, %v327_v26, %v325_v23 }
 0x13c   :  { %v333_v38 = vsel %vm332_vm3, %v331_v33, %v329_v29 }
 0x142   :  { %v264_v0 = vpop.permute.xlu0 %263 }
 0x143   :  { %v560_v1 = vpop.permute.xlu2 %266  ;;  %v339_v44 = vperm.slane %v264_v0, %v338_v28  ;;  %v362_v0 = vadd.s32 4294967208, %v571_v10 }
 0x144   :  { %v343_v50 = vperm.slane %v560_v1, %v342_v37 }
 0x14b   :  { %v261_v2 = vpop.permute.xlu1 %260 }
 0x14c   :  { %v335_v30 = vperm.slane %v261_v2, %v334_v24 }
 0x14e   :  { %v337_v41 = vsel %vm336_vm4, %v335_v30, %v333_v38 }
 0x14f   :  { %v341_v46 = vsel %vm340_vm5, %v339_v44, %v337_v41 }
 0x150   :  { %v345_v55 = vsel %vm344_vm6, %v343_v50, %v341_v46 }
 0x152   :  { %v562_v3 = vpop.permute.xlu0 %272 }
 0x153   :  { %v564_v4 = vpop.permute.xlu2 %275  ;;  %v566_v5 = vpop.permute.xlu1 %269  ;;  %v351_v62 = vperm.slane %v562_v3, %v350_v47 }
 0x154   :  { %v347_v48 = vperm.slane %v566_v5, %v346_v39 }
 0x156   :  { %v349_v58 = vsel %vm348_vm7, %v347_v48, %v345_v55 }
 0x157   :  { %v353_v1 = vsel %vm352_vm8, %v351_v62, %v349_v58 }
 0x15a   :  { %v285_v6 = vpop.permute.xlu0 %284 }
 0x15b   :  { %v288_v7 = vpop.permute.xlu2 %287  ;;  %v366_v14 = vperm.slane %v285_v6, %v571_v10 }
 0x15c   :  { %v367_v15 = vperm.slane %v288_v7, %v322_v11  ;;  %v355_v7 = vperm.slane %v564_v4, %v354_v53 }
 0x15e   :  { %v368_v22 = vsel %vm324_vm1, %v367_v15, %v366_v14 }
 0x162   :  { %v568_v8 = vpop.permute.xlu1 %278  ;;  %v294_v9 = vpop.permute.xlu0 %293 }
 0x163   :  { %v297_v13 = vpop.permute.xlu2 %296  ;;  %v371_v27 = vperm.slane %v294_v9, %v330_v21  ;;  %v359_v2 = vperm.slane %v568_v8, %v358_v56  ;;  %v397_v8 = vstv %s599_s2 }
 0x164   :  { %v373_v34 = vperm.slane %v297_v13, %v334_v24 }
 0x16a   :  { %v291_v16 = vpop.permute.xlu1 %290  ;;  %v303_v19 = vpop.permute.xlu0 %302 }
 0x16b   :  { %v369_v18 = vperm.slane %v291_v16, %v326_v12  ;;  %v306_v35 = vpop.permute.xlu2 %305  ;;  %v377_v45 = vperm.slane %v303_v19, %v342_v37  ;;  %v357_v12 = vsel %vm356_vm9, %v355_v7, %v353_v1 }
 0x16c   :  { %v379_v51 = vperm.slane %v306_v35, %v346_v39  ;;  %v361_v3 = vsel %vm360_vm10, %v359_v2, %v357_v12 }
 0x16d   :  { %v370_v25 = vsel %vm328_vm2, %v369_v18, %v368_v22 }
 0x16e   :  { %v372_v31 = vsel %vm332_vm3, %v371_v27, %v370_v25 }
 0x16f   :  { %v374_v40 = vsel %vm336_vm4, %v373_v34, %v372_v31 }
 0x172   :  { %v300_v32 = vpop.permute.xlu1 %299  ;;  %v312_v43 = vpop.permute.xlu0 %311 }
 0x173   :  { %v375_v36 = vperm.slane %v300_v32, %v338_v28  ;;  %v383_v59 = vperm.slane %v312_v43, %v354_v53  ;;  %v315_v60 = vpop.permute.xlu2 %314 }
 0x174   :  { %v385_v5 = vperm.slane %v315_v60, %v358_v56 }
 0x175   :  { %v376_v42 = vsel %vm340_vm5, %v375_v36, %v374_v40 }
 0x176   :  { %v378_v49 = vsel %vm344_vm6, %v377_v45, %v376_v42 }
 0x177   :  { %v380_v57 = vsel %vm348_vm7, %v379_v51, %v378_v49 }
 0x17a   :  { %v309_v52 = vpop.permute.xlu1 %308 }
 0x17b   :  { %v381_v54 = vperm.slane %v309_v52, %v350_v47  ;;  %v318_v6 = vpop.permute.xlu0 %317 }
 0x17c   :  { %v387_v13 = vperm.slane %v318_v6, %v362_v0 }
 0x17d   :  { %v382_v61 = vsel %vm352_vm8, %v381_v54, %v380_v57 }
 0x17e   :  { %v384_v63 = vsel %vm356_vm9, %v383_v59, %v382_v61 }
 0x17f   :  { %v386_v11 = vsel %vm360_vm10, %v385_v5, %v384_v63 }
 0x180   :  { %v388_v16 = vsel %vm364_vm11, %v387_v13, %v386_v11 }
 0x182   :  { %v282_v9 = vpop.permute.xlu1 %281 }
 0x183   :  { %v363_v14 = vperm.slane %v282_v9, %v362_v0 }
 0x185   :  { %v365_v15 = vsel %vm364_vm11, %v363_v14, %v361_v3 }
 0x186   :  { %v390_v10 = vsel %vm389_vm12, %v388_v16, %v365_v15 }
 0x187   :  { %v393_v17 = vsel %vm392_vm13, %v390_v10, 0.0 }
 0x188   :  { %394 = vadd.xlane.f32.xlu2 %v393_v17 }
 0x1fb   :  { %v395_v4 = vpop.xlane.xlu2 %394 }
 0x1fc   :  { %v398_v18 = vadd.f32 %v397_v8, %v395_v4 }
 0x1fe   :  { %400 = vst.msk [vmem:[%s600_s3] sm:$0x3] %vm399_vm14, %v398_v18 }

</bundles_post_ra>
